<compile_context>
chip_gen: v7x
topology: tpu7x:2x2x1
jax: 0.10.0
libtpu: 0.0.40
codegen_flags: <defaults>
</compile_context>

<pallas_src>
import functools
import math

import jax
import jax.numpy as jnp
from jax.experimental import pallas as pl
from jax.experimental.pallas import tpu as pltpu


def _cdiv(a, b):
    return -(-a // b)


def _sublane_pack(dtype):
    # Sub-32-bit dtypes pack along sublanes: 8 rows for f32, 16 for bf16, 32 for int8/fp8.
    return {4: 8, 2: 16, 1: 32}.get(jnp.dtype(dtype).itemsize, 8)


def _vmem_budgets():
    """(per-input-buffer tile budget, scoped vmem limit), chosen per TPU generation."""
    vmem = None
    try:
        vmem = getattr(pltpu.get_tpu_info(), "vmem_capacity_bytes", None)
    except Exception:
        vmem = None
    if vmem is not None and vmem >= 96 * 1024 * 1024:
        # v5e / v6e: 128 MiB VMEM -> bigger tiles, fewer grid steps (less per-step overhead).
        return 16 * 1024 * 1024, 64 * 1024 * 1024
    # v7x (64 MiB per TensorCore) or unknown hardware: stay conservative.
    return 6 * 1024 * 1024, 32 * 1024 * 1024


def _gap_kernel(x_ref, o_ref, acc_ref, *, inv_l, l, tile_l, mask_tail):
    k = pl.program_id(1)

    @pl.when(k == 0)
    def _init():
        acc_ref[...] = jnp.zeros_like(acc_ref)

    x = x_ref[...]
    if mask_tail:
        # Last L strip overhangs the array: zero the out-of-bounds columns so garbage
        # reads cannot corrupt valid rows.  (Python-level gate: zero cost when L divides.)
        col = jax.lax.broadcasted_iota(jnp.int32, x.shape, 1) + k * tile_l
        x = jnp.where(col < l, x, jnp.zeros_like(x))

    # f32 accumulation done inside the reduce — no full-tile f32 temporary for bf16/int8.
    acc_ref[...] += jnp.sum(x, axis=-1, keepdims=True, dtype=jnp.float32)

    @pl.when(k == pl.num_programs(1) - 1)
    def _finish():
        # TODO(synk): a lane-dense (1, tile_rows) output row would avoid 1-lane masked
        # stores, but needs a (R,1)->(1,R) sublane->lane relayout whose Mosaic lowering
        # is not guaranteed; output traffic is only N elements, so keep the column.
        o_ref[...] = (acc_ref[...] * inv_l).astype(o_ref.dtype)


def global_avg_pool(x, *, tile_rows=None, tile_l=None, vmem_limit_bytes=None):
    """Pallas equivalent of `x.view(*x.shape[:-2], -1).mean(-1)`."""
    assert x.ndim >= 2, "GlobalAvgPool needs at least two trailing dims"
    lead = x.shape[:-2]
    n = int(math.prod(lead)) if lead else 1
    l = int(x.shape[-2]) * int(x.shape[-1])
    # torch.mean only exists for floating dtypes; promote anything else to f32.
    out_dtype = x.dtype if jnp.issubdtype(x.dtype, jnp.floating) else jnp.float32

    x2 = x.reshape(n, l)
    itemsize = x2.dtype.itemsize
    sub = _sublane_pack(x2.dtype)
    budget, default_limit = _vmem_budgets()
    if vmem_limit_bytes is None:
        vmem_limit_bytes = default_limit
    small_vmem = default_limit <= 32 * 1024 * 1024   # proxy for v7x (2 TensorCores)

    # Largest legal row tile: a sublane-pack multiple, never larger than n (a second-minor
    # block dim must be a pack multiple or equal the full array dim).
    cap_rows = n if n <= sub else (n // sub) * sub
    min_rows = min(sub, cap_rows)

    if tile_l is None:
        if l * itemsize * min_rows <= budget:
            tile_l = l                               # whole rows fit comfortably: no L split
        else:
            # Split the reduction axis into 128-lane-aligned strips near the VMEM sweet spot.
            tile_l = max(128, min(budget // (min_rows * itemsize), l) // 128 * 128)
    tile_l = int(tile_l)
    if tile_l < l:
        tile_l = max(128, tile_l // 128 * 128)       # keep lane alignment when splitting
    tile_l = min(tile_l, l)

    if tile_rows is None:
        if tile_l == l:
            tile_rows = max(sub, (budget // max(l * itemsize, 1)) // sub * sub)
            if small_vmem and n >= 2 * sub:
                # v7x megacore: keep >= 2 steps on the parallel row axis so both TCs work.
                tile_rows = min(tile_rows, max(sub, _cdiv(n, 2) // sub * sub))
        else:
            tile_rows = min_rows
    tile_rows = min(int(tile_rows), cap_rows)
    if tile_rows < n:
        tile_rows = max(sub, tile_rows // sub * sub)
        tile_rows = min(tile_rows, cap_rows)

    num_row_tiles = _cdiv(n, tile_rows)
    num_l = _cdiv(l, tile_l)
    mask_tail = (num_l > 1) and (l % tile_l != 0)

    kernel = functools.partial(_gap_kernel, inv_l=1.0 / float(l), l=l,
                               tile_l=tile_l, mask_tail=mask_tail)

    # TODO(synk): for very small tiles, pipeline_mode=pl.Buffered(3) on the input spec may
    # hide exposed DMA latency; left at default double-buffering here.
    out = pl.pallas_call(
        kernel,
        out_shape=jax.ShapeDtypeStruct((n, 1), out_dtype),
        grid_spec=pltpu.PrefetchScalarGridSpec(
            num_scalar_prefetch=0,
            grid=(num_row_tiles, num_l),
            in_specs=[pl.BlockSpec((tile_rows, tile_l), lambda i, k: (i, k))],
            out_specs=pl.BlockSpec((tile_rows, 1), lambda i, k: (i, 0)),
            scratch_shapes=[pltpu.VMEM((tile_rows, 1), jnp.float32)],
        ),
        compiler_params=pltpu.CompilerParams(
            dimension_semantics=("parallel", "arbitrary"),
            vmem_limit_bytes=vmem_limit_bytes,
        ),
        cost_estimate=pl.CostEstimate(
            flops=n * l,
            transcendentals=0,
            bytes_accessed=n * l * itemsize + n * jnp.dtype(out_dtype).itemsize,
        ),
    )(x2)

    return out[:, 0].reshape(lead)


def _reference(x):
    return jnp.mean(x.reshape(*x.shape[:-2], -1), axis=-1)


if __name__ == "__main__":
    key = jax.random.PRNGKey(0)
    k1, k2, k3, k4 = jax.random.split(key, 4)

    # NCHW example consistent with the module: batch=2, channels=4, 16x16 spatial.
    x = jax.random.normal(k1, (2, 4, 16, 16), dtype=jnp.float32)
    y = jax.block_until_ready(global_avg_pool(x))
    assert y.shape == (2, 4), y.shape
    assert jnp.allclose(y, _reference(x), atol=1e-5, rtol=1e-5)

    # Odd leading/spatial sizes: ragged multi-step row grid, no padding copy.
    # torch semantics: x.view(3, 5, -1).mean(-1) -> shape (3, 5).
    x2 = jax.random.normal(k2, (3, 5, 7, 9), dtype=jnp.float32)
    y2 = jax.block_until_ready(global_avg_pool(x2))
    assert y2.shape == (3, 5), y2.shape
    assert jnp.allclose(y2, _reference(x2), atol=1e-5, rtol=1e-5)

    # Force the split-L accumulator path (L=280, tile_l=128 -> 3 strips, masked tail strip).
    x3 = jax.random.normal(k3, (2, 3, 10, 28), dtype=jnp.float32)
    y3 = jax.block_until_ready(global_avg_pool(x3, tile_l=128))
    assert y3.shape == (2, 3), y3.shape
    assert jnp.allclose(y3, _reference(x3), atol=1e-5, rtol=1e-5)

    # bf16 exercises the 16-row sublane pack and a ragged last row tile (n=21, tile=16).
    x4 = jax.random.normal(k4, (3, 7, 8, 8), dtype=jnp.bfloat16)
    y4 = jax.block_until_ready(global_avg_pool(x4))
    assert y4.shape == (3, 7), y4.shape
    ref4 = jnp.mean(x4.astype(jnp.float32).reshape(3, 7, -1), axis=-1)
    assert jnp.allclose(y4.astype(jnp.float32), ref4, atol=1e-2, rtol=1e-2)

    print("KERNEL_OK")
</pallas_src>

<mosaic_0001>
module attributes {stable_mosaic.version = 11 : i64} {
  func.func @_gap_kernel(%arg0: i32, %arg1: i32, %arg2: memref<8x256xf32, #tpu.memory_space<vmem>>, %arg3: memref<8x1xf32, #tpu.memory_space<vmem>>, %arg4: memref<8x1xf32, #tpu.memory_space<vmem>>) attributes {dimension_semantics = [#tpu.dimension_semantics<parallel>, #tpu.dimension_semantics<arbitrary>], iteration_bounds = array<i64: 1, 1>, scalar_prefetch = 0 : i64, scratch_operands = 1 : i64, tpu.core_type = #tpu.core_type<tc>, window_params = [{transform_indices = @transform_0, window_bounds = array<i64: 8, 256>}, {transform_indices = @transform_1, window_bounds = array<i64: 8, 1>}]} {
    %c0_i32 = arith.constant 0 : i32
    %0 = arith.cmpi eq, %arg1, %c0_i32 : i32
    %1 = arith.extui %0 : i1 to i32
    %c0_i32_0 = arith.constant 0 : i32
    %2 = arith.cmpi ne, %1, %c0_i32_0 : i32
    scf.if %2 {
      %cst_8 = arith.constant 0.000000e+00 : f32
      %12 = vector.broadcast %cst_8 : f32 to vector<8x1xf32>
      %c0_9 = arith.constant 0 : index
      %c0_10 = arith.constant 0 : index
      %13 = vector.load %arg4[%c0_9, %c0_10] : memref<8x1xf32, #tpu.memory_space<vmem>>, vector<8x1xf32>
      tpu.vector_store %arg4[%c0_9, %c0_10], %12 {strides = array<i32>} : memref<8x1xf32, #tpu.memory_space<vmem>>, vector<8x1xf32>,
    } else {
    }
    %c0 = arith.constant 0 : index
    %c0_1 = arith.constant 0 : index
    %3 = vector.load %arg2[%c0, %c0_1] : memref<8x256xf32, #tpu.memory_space<vmem>>, vector<8x256xf32>
    %c0_2 = arith.constant 0 : index
    %c0_3 = arith.constant 0 : index
    %4 = vector.load %arg4[%c0_2, %c0_3] : memref<8x1xf32, #tpu.memory_space<vmem>>, vector<8x1xf32>
    %cst = arith.constant dense<0.000000e+00> : vector<8xf32>
    %5 = vector.multi_reduction <add>, %3, %cst [1] : vector<8x256xf32> to vector<8xf32>
    %6 = vector.shape_cast %5 : vector<8xf32> to vector<8x1xf32>
    %7 = arith.addf %4, %6 : vector<8x1xf32>
    %c0_4 = arith.constant 0 : index
    %c0_5 = arith.constant 0 : index
    %8 = vector.load %arg4[%c0_4, %c0_5] : memref<8x1xf32, #tpu.memory_space<vmem>>, vector<8x1xf32>
    tpu.vector_store %arg4[%c0_4, %c0_5], %7 {strides = array<i32>} : memref<8x1xf32, #tpu.memory_space<vmem>>, vector<8x1xf32>,
    %c0_i32_6 = arith.constant 0 : i32
    %9 = arith.cmpi eq, %arg1, %c0_i32_6 : i32
    %10 = arith.extui %9 : i1 to i32
    %c0_i32_7 = arith.constant 0 : i32
    %11 = arith.cmpi ne, %10, %c0_i32_7 : i32
    scf.if %11 {
      %c0_8 = arith.constant 0 : index
      %c0_9 = arith.constant 0 : index
      %12 = vector.load %arg4[%c0_8, %c0_9] : memref<8x1xf32, #tpu.memory_space<vmem>>, vector<8x1xf32>
      %cst_10 = arith.constant 3.906250e-03 : f32
      %13 = vector.broadcast %cst_10 : f32 to vector<8x1xf32>
      %14 = arith.mulf %12, %13 : vector<8x1xf32>
      %c0_11 = arith.constant 0 : index
      %c0_12 = arith.constant 0 : index
      %15 = vector.load %arg3[%c0_11, %c0_12] : memref<8x1xf32, #tpu.memory_space<vmem>>, vector<8x1xf32>
      tpu.vector_store %arg3[%c0_11, %c0_12], %14 {strides = array<i32>} : memref<8x1xf32, #tpu.memory_space<vmem>>, vector<8x1xf32>,
    } else {
    }
    return
  }
  func.func @transform_0(%arg0: i32, %arg1: i32) -> (i32, i32) {
    %c0_i32 = arith.constant 0 : i32
    return %arg0, %arg1 : i32, i32
  }
  func.func @transform_1(%arg0: i32, %arg1: i32) -> (i32, i32) {
    %c0_i32 = arith.constant 0 : i32
    %c0_i32_0 = arith.constant 0 : i32
    return %arg0, %c0_i32 : i32, i32
  }
}

</mosaic_0001>

<bundles_post_ra>
// kernel: tpu_custom_call.1
= control target key start
LH: loop header
LB: loop body
LE: loop exit
PB: predicated region body
PF: predicated region fallthrough
CT: control target
= control target key end

     0   :  { %6 = vsyncpa [#allocation4], 0  ;;  %s72_s6 = smov [#allocation3]   ;;  %s99_s0 = inlined_call_operand.hbm [shape: f32[8,256], index: 0, kind: input, shape index: {}]   ;;  %s100_s1 = inlined_call_operand.vmem [shape: f32[8,1], index: 1, kind: output, shape index: {}]  }
   0x1   :  { %s13_s7 = sshll.u32 %s72_s6, 4  ;;  %s48_s10 = scalar_lea.hbm %s99_s0, 256  ;;  %s14_s7 = int_to_ptr.vmem [resolvable:$true] %s13_s7 }
   0x2   :  { %p49_p0 = scmp.ne.s32.totalorder %s99_s0, %s48_s10  ;;  %p52_p1 = scmp.lt.u32.totalorder %s48_s10, %s99_s0 }
   0x4   :  { %p54_p2 = pnand %p52_p1, %p49_p0 }
   0x6   :  { %57 = shalt.err (!%p54_p2)
}
   0x7   :  { %s58_s15 = scalar_lea.vmem %s14_s7, 256  ;;  %p63_p4 = scmp.lt.s32.totalorder %s14_s7, %s14_s7 }
   0x8   :  { %p59_p3 = scmp.ne.s32.totalorder %s14_s7, %s58_s15  ;;  %p64_p5 = scmp.lt.s32.totalorder %s58_s15, %s58_s15 }
   0xa   :  { %p65_p6 = por %p64_p5, %p63_p4 }
   0xc   :  { %p66_p7 = pnand %p65_p6, %p59_p3 }
   0xe   :  { %69 = shalt.err (!%p66_p7)
}
   0xf   :  { %16 = dma.hbm_to_vmem [thread:$0]  %s99_s0, 256, %s14_s7, [#allocation4]  }
  0x10   :  { %70 = dma.done.wait [#allocation4], 256  }
  0x11   :  { %71 = vsyncadd [#allocation4], 4294967040  ;;  %vm24_vm0 = vcmask 7168   ;;  %v73_v0 = vmov 0.0   ;;  %v26_v1 = vld [vmem:[#allocation3] sm:$0xff]  ;;  %v27_v2 = vld [vmem:[#allocation3 + $0x8] sm:$0xff] }
  0x12   :  { %25 = vst.msk [vmem:[#allocation2] sm:$0xff] %vm24_vm0, %v73_v0  ;;  %v29_v3 = vadd.f32 %v27_v2, %v26_v1 }
  0x14   :  { %30 = vadd.xlane.f32.xlu0 %v29_v3 }
  0x19   :  { %v28_v4 = vld [vmem:[#allocation2] sm:$0xff] }
  0xa1   :  { %v31_v5 = vpop.xlane.xlu0 %30 }
  0xa2   :  { %v32_v6 = vadd.f32 %v31_v5, %v28_v4 }
  0xa4   :  { %34 = vst.msk [vmem:[#allocation2] sm:$0xff] %vm24_vm0, %v32_v6 }
  0xab   :  { %v38_v7 = vld [vmem:[#allocation2] sm:$0xff] }
  0xac   :  { %v39_v8 = vmul.f32 0.00390625, %v38_v7 }
  0xae   :  { %40 = vst.msk [vmem:[%s100_s1] sm:$0xff] %vm24_vm0, %v39_v8 }
  0xaf   :  { %45 = vsyncpa [#allocation4], 1 }

</bundles_post_ra>
